<compile_context>
chip_gen: v5e
topology: v5e:2x2
jax: 0.10.0
libtpu: 0.0.40
codegen_flags: <defaults>
</compile_context>

<pallas_src>
import functools

import jax
import jax.numpy as jnp
from jax.experimental import pallas as pl
from jax.experimental.pallas import tpu as pltpu


# ----------------------------------------------------------------------------
# Pallas kernels
# ----------------------------------------------------------------------------
def _xw_kernel(x_ref, w_ref, o_ref):
    """Feature-transform prologue: one row-tile of x @ W (bf16 MXU, f32 acc)."""
    o_ref[...] = jnp.dot(x_ref[...].astype(jnp.bfloat16), w_ref[...],
                         preferred_element_type=jnp.float32).astype(o_ref.dtype)


def _dec_prologue_kernel(alpha_ref, z_ref, we_ref, mask_ref, wc_ref, o_ref):
    """Decoder prologue: PReLU -> enc_to_dec (no bias) -> zero masked rows -> Wc."""
    alpha = alpha_ref[0]                                   # scalar from SMEM
    z = z_ref[...]
    x = jnp.where(z > 0, z, alpha * z)                     # PReLU
    x = jnp.dot(x.astype(jnp.bfloat16), we_ref[...],
                preferred_element_type=jnp.float32)        # enc_to_dec
    x = x * (1.0 - mask_ref[...])                          # x[mask == 1] = 0
    xw = jnp.dot(x.astype(jnp.bfloat16), wc_ref[...],
                 preferred_element_type=jnp.float32)       # GCNConv weight
    o_ref[...] = xw.astype(o_ref.dtype)


def _spmm_kernel(a_ref, xw_ref, b_ref, o_ref, acc_ref):
    """Tiled A_hat @ XW (+bias) with a VMEM f32 accumulator over the reduction axis."""
    k = pl.program_id(1)

    @pl.when(k == 0)
    def _():
        acc_ref[...] = jnp.zeros_like(acc_ref)

    acc_ref[...] += jnp.dot(a_ref[...], xw_ref[...],
                            preferred_element_type=jnp.float32)

    @pl.when(k == pl.num_programs(1) - 1)
    def _():
        o_ref[...] = (acc_ref[...] + b_ref[...]).astype(o_ref.dtype)


def _bn_kernel(h_ref, gamma_ref, beta_ref, o_ref, *, n_real, apply_relu):
    """BatchNorm1d (training stats over the real node rows) + optional ReLU."""
    h = h_ref[...]
    row_ids = jax.lax.broadcasted_iota(jnp.int32, h.shape, 0)
    valid = (row_ids < n_real).astype(jnp.float32)         # mask out padded rows
    inv_n = jnp.float32(1.0 / float(n_real))
    mean = jnp.sum(h * valid, axis=0, keepdims=True) * inv_n
    diff = (h - mean) * valid
    var = jnp.sum(diff * diff, axis=0, keepdims=True) * inv_n
    out = (h - mean) * jax.lax.rsqrt(var + 1e-5) * gamma_ref[...] + beta_ref[...]
    if apply_relu:
        out = jnp.maximum(out, 0.0)
    # TODO(synk): F.dropout is identity here (drop_ratio=0 default); a nonzero
    # rate would need pltpu.prng_random_bits-based masking.
    o_ref[...] = out.astype(o_ref.dtype)


# ----------------------------------------------------------------------------
# pallas_call wrappers
# ----------------------------------------------------------------------------
def _round_up(n, m):
    return ((n + m - 1) // m) * m


def _choose_tile(n_pad):
    for t in (512, 256, 128):
        if n_pad % t == 0:
            return t
    return 128


def xw_prologue(x, w_bf16, tm):
    n_pad, d_in = x.shape
    d_out = w_bf16.shape[1]
    return pl.pallas_call(
        _xw_kernel,
        out_shape=jax.ShapeDtypeStruct((n_pad, d_out), jnp.bfloat16),
        grid=(n_pad // tm,),
        in_specs=[pl.BlockSpec((tm, d_in), lambda i: (i, 0)),
                  pl.BlockSpec((d_in, d_out), lambda i: (0, 0))],
        out_specs=pl.BlockSpec((tm, d_out), lambda i: (i, 0)),
        compiler_params=pltpu.CompilerParams(dimension_semantics=("parallel",)),
    )(x, w_bf16)


def decoder_prologue(alpha, z, w_e2d_bf16, mask, w_conv_bf16, tm):
    n_pad, lat = z.shape
    d_out = w_conv_bf16.shape[1]
    return pl.pallas_call(
        _dec_prologue_kernel,
        out_shape=jax.ShapeDtypeStruct((n_pad, d_out), jnp.bfloat16),
        grid=(n_pad // tm,),
        in_specs=[pl.BlockSpec(memory_space=pltpu.MemorySpace.SMEM),   # alpha scalar
                  pl.BlockSpec((tm, lat), lambda i: (i, 0)),
                  pl.BlockSpec((lat, lat), lambda i: (0, 0)),
                  pl.BlockSpec((tm, 1), lambda i: (i, 0)),
                  pl.BlockSpec((lat, d_out), lambda i: (0, 0))],
        out_specs=pl.BlockSpec((tm, d_out), lambda i: (i, 0)),
        compiler_params=pltpu.CompilerParams(dimension_semantics=("parallel",)),
    )(alpha, z, w_e2d_bf16, mask, w_conv_bf16)


def spmm_bias(a_bf16, xw_bf16, bias, tm, tk):
    n_pad = a_bf16.shape[0]
    d_out = xw_bf16.shape[1]
    return pl.pallas_call(
        _spmm_kernel,
        out_shape=jax.ShapeDtypeStruct((n_pad, d_out), jnp.float32),
        grid=(n_pad // tm, n_pad // tk),                 # reduction axis last
        in_specs=[pl.BlockSpec((tm, tk), lambda i, k: (i, k)),
                  pl.BlockSpec((tk, d_out), lambda i, k: (k, 0)),
                  pl.BlockSpec((1, d_out), lambda i, k: (0, 0))],
        out_specs=pl.BlockSpec((tm, d_out), lambda i, k: (i, 0)),
        scratch_shapes=[pltpu.VMEM((tm, d_out), jnp.float32)],
        compiler_params=pltpu.CompilerParams(
            dimension_semantics=("parallel", "arbitrary"),
            vmem_limit_bytes=64 * 1024 * 1024),
    )(a_bf16, xw_bf16, bias)


def bn_epilogue(h, gamma, beta, *, n_real, apply_relu):
    # TODO(synk): for very large N split this into a tiled stats-accumulate +
    # normalize kernel pair; [N, D] with D<=128 is negligible next to the SpMM.
    n_pad, d = h.shape
    kernel = functools.partial(_bn_kernel, n_real=n_real, apply_relu=apply_relu)
    return pl.pallas_call(
        kernel,
        out_shape=jax.ShapeDtypeStruct((n_pad, d), jnp.float32),
        in_specs=[pl.BlockSpec((n_pad, d), lambda: (0, 0)),
                  pl.BlockSpec((1, d), lambda: (0, 0)),
                  pl.BlockSpec((1, d), lambda: (0, 0))],
        out_specs=pl.BlockSpec((n_pad, d), lambda: (0, 0)),
    )(h, gamma, beta)


# ----------------------------------------------------------------------------
# Glue: dense normalized adjacency, parameters, end-to-end forward
# ----------------------------------------------------------------------------
def normalized_adjacency(edge_index, num_nodes):
    """A_hat = D^{-1/2} (A + I) D^{-1/2}  (GCN gcn_norm, add_remaining_self_loops)."""
    # TODO(synk): for realistic sparse graphs replace this dense O(N^2) adjacency
    # with a CSR scalar-prefetch SpMM (PrefetchScalarGridSpec-driven row gather).
    src, dst = edge_index
    a = jnp.zeros((num_nodes, num_nodes), jnp.float32)
    a = a.at[dst, src].max(1.0)          # message flows src -> dst
    a = a.at[src, dst].max(1.0)          # symmetric (undirected)
    a = jnp.maximum(a, jnp.eye(num_nodes, dtype=jnp.float32))   # self-loops (no double count)
    deg = jnp.sum(a, axis=1)
    d_inv_sqrt = jnp.where(deg > 0, 1.0 / jnp.sqrt(deg), 0.0)
    return d_inv_sqrt[:, None] * a * d_inv_sqrt[None, :]


def init_params(key, in_dim, hidden_dim, latent_dim):
    ks = jax.random.split(key, 8)
    return {
        # encoder layer 0: in_dim -> hidden_dim
        "w1": jax.random.normal(ks[0], (in_dim, hidden_dim), jnp.float32) * 0.1,
        "b1": jax.random.normal(ks[1], (1, hidden_dim), jnp.float32) * 0.1,
        "gamma1": jnp.ones((1, hidden_dim), jnp.float32),
        "beta1": jnp.zeros((1, hidden_dim), jnp.float32),
        # encoder layer 1: hidden_dim -> latent_dim
        "w2": jax.random.normal(ks[2], (hidden_dim, latent_dim), jnp.float32) * 0.1,
        "b2": jax.random.normal(ks[3], (1, latent_dim), jnp.float32) * 0.1,
        "gamma2": jnp.ones((1, latent_dim), jnp.float32),
        "beta2": jnp.zeros((1, latent_dim), jnp.float32),
        # decoder
        "prelu_a": jnp.full((1,), 0.25, jnp.float32),        # nn.PReLU default weight
        "w_e2d": jax.random.normal(ks[4], (latent_dim, latent_dim), jnp.float32) * 0.1,
        "w_conv": jax.random.normal(ks[5], (latent_dim, in_dim), jnp.float32) * 0.1,
        "b_conv": jax.random.normal(ks[6], (1, in_dim), jnp.float32) * 0.1,
        # NOTE: dec_token exists in the PyTorch module but is unused in forward().
    }


def _pad2(a, rows, cols):
    return jnp.pad(a, ((0, rows - a.shape[0]), (0, cols - a.shape[1])))


def _pad_params(params, d_in_p, hid_p, lat_p):
    return {
        "w1": _pad2(params["w1"], d_in_p, hid_p).astype(jnp.bfloat16),
        "b1": _pad2(params["b1"], 1, hid_p),
        "gamma1": _pad2(params["gamma1"], 1, hid_p),
        "beta1": _pad2(params["beta1"], 1, hid_p),
        "w2": _pad2(params["w2"], hid_p, lat_p).astype(jnp.bfloat16),
        "b2": _pad2(params["b2"], 1, lat_p),
        "gamma2": _pad2(params["gamma2"], 1, lat_p),
        "beta2": _pad2(params["beta2"], 1, lat_p),
        "prelu_a": params["prelu_a"].reshape(-1)[:1],
        "w_e2d": _pad2(params["w_e2d"], lat_p, lat_p).astype(jnp.bfloat16),
        "w_conv": _pad2(params["w_conv"], lat_p, d_in_p).astype(jnp.bfloat16),
        "b_conv": _pad2(params["b_conv"], 1, d_in_p),
    }


def graphmae_forward(params, x, edge_index, mask_vector):
    n, d_in = x.shape
    hidden = params["w1"].shape[1]
    latent = params["w2"].shape[1]

    n_pad = _round_up(n, 128)
    d_in_p = _round_up(d_in, 128)
    hid_p = _round_up(hidden, 128)
    lat_p = _round_up(latent, 128)
    tm = tk = _choose_tile(n_pad)

    p = _pad_params(params, d_in_p, hid_p, lat_p)

    a_hat = normalized_adjacency(edge_index, n)
    a_bf16 = jnp.zeros((n_pad, n_pad), jnp.float32).at[:n, :n].set(a_hat).astype(jnp.bfloat16)

    x_pad = _pad2(x, n_pad, d_in_p)
    mask = mask_vector.reshape(n, 1).astype(jnp.float32)
    mask_pad = jnp.pad(mask, ((0, n_pad - n), (0, 0)), constant_values=1.0)

    # ---- Encoder layer 1 ----
    xw1 = xw_prologue(x_pad, p["w1"], tm)
    h1 = spmm_bias(a_bf16, xw1, p["b1"], tm, tk)
    h1 = bn_epilogue(h1, p["gamma1"], p["beta1"], n_real=n, apply_relu=True)
    # ---- Encoder layer 2 ----
    xw2 = xw_prologue(h1, p["w2"], tm)
    z = spmm_bias(a_bf16, xw2, p["b2"], tm, tk)
    z = bn_epilogue(z, p["gamma2"], p["beta2"], n_real=n, apply_relu=False)
    # ---- Decoder ----
    xw_d = decoder_prologue(p["prelu_a"], z, p["w_e2d"], mask_pad, p["w_conv"], tm)
    out = spmm_bias(a_bf16, xw_d, p["b_conv"], tm, tk)

    return out[:n, :d_in]


# Pure-JAX reference with the same bf16 matmul-operand casts for a tight check.
def graphmae_ref(params, x, edge_index, mask_vector):
    n = x.shape[0]
    bf = jnp.bfloat16
    a = normalized_adjacency(edge_index, n).astype(bf)

    def gcn_bn(h, w, b, g, be, relu):
        xw = jnp.dot(h.astype(bf), w.astype(bf),
                     preferred_element_type=jnp.float32).astype(bf)
        hh = jnp.dot(a, xw, preferred_element_type=jnp.float32) + b
        mean = jnp.sum(hh, 0, keepdims=True) / n
        var = jnp.sum((hh - mean) ** 2, 0, keepdims=True) / n
        hh = (hh - mean) * jax.lax.rsqrt(var + 1e-5) * g + be
        return jnp.maximum(hh, 0.0) if relu else hh

    h1 = gcn_bn(x, params["w1"], params["b1"], params["gamma1"], params["beta1"], True)
    z = gcn_bn(h1, params["w2"], params["b2"], params["gamma2"], params["beta2"], False)

    alpha = params["prelu_a"].reshape(())
    xx = jnp.where(z > 0, z, alpha * z)
    xx = jnp.dot(xx.astype(bf), params["w_e2d"].astype(bf),
                 preferred_element_type=jnp.float32)
    xx = xx * (1.0 - mask_vector.reshape(n, 1))
    xw = jnp.dot(xx.astype(bf), params["w_conv"].astype(bf),
                 preferred_element_type=jnp.float32).astype(bf)
    return jnp.dot(a, xw, preferred_element_type=jnp.float32) + params["b_conv"]


if __name__ == "__main__":
    N, IN_DIM, HIDDEN_DIM, LATENT_DIM = 8, 4, 32, 16

    key = jax.random.PRNGKey(0)
    k_x, k_p, k_m = jax.random.split(key, 3)

    x = jax.random.normal(k_x, (N, IN_DIM), jnp.float32)
    # deterministic ring graph (undirected)
    src = jnp.arange(N, dtype=jnp.int32)
    dst = (src + 1) % N
    edge_index = jnp.stack([src, dst], axis=0)
    mask_vector = (jax.random.uniform(k_m, (N, 1)) < 0.3).astype(jnp.float32)

    params = init_params(k_p, IN_DIM, HIDDEN_DIM, LATENT_DIM)

    out = graphmae_forward(params, x, edge_index, mask_vector)
    out = jax.block_until_ready(out)

    ref = graphmae_ref(params, x, edge_index, mask_vector)
    assert out.shape == (N, IN_DIM)
    max_err = float(jnp.max(jnp.abs(out - ref)))
    # bf16 matmul operands (matched in the reference) make bit-exactness impossible;
    # expected disagreement is ~1e-4 on outputs of magnitude ~0.2.
    assert jnp.allclose(out, ref, atol=1e-2, rtol=1e-2), f"mismatch vs reference (max abs err {max_err})"

    print("KERNEL_OK")
</pallas_src>

<mosaic_0001>
module attributes {stable_mosaic.version = 11 : i64} {
  func.func @_xw_kernel(%arg0: i32, %arg1: memref<128x128xf32, #tpu.memory_space<vmem>>, %arg2: memref<128x128xbf16, #tpu.memory_space<vmem>>, %arg3: memref<128x128xbf16, #tpu.memory_space<vmem>>) attributes {dimension_semantics = [#tpu.dimension_semantics<parallel>], iteration_bounds = array<i64: 1>, scalar_prefetch = 0 : i64, scratch_operands = 0 : i64, tpu.core_type = #tpu.core_type<tc>, window_params = [{transform_indices = @transform_0, window_bounds = array<i64: 128, 128>}, {pipeline_mode = #tpu.pipeline_mode<synchronous>, transform_indices = @transform_1, window_bounds = array<i64: 128, 128>}, {transform_indices = @transform_2, window_bounds = array<i64: 128, 128>}]} {
    %c0 = arith.constant 0 : index
    %c0_0 = arith.constant 0 : index
    %0 = vector.load %arg1[%c0, %c0_0] : memref<128x128xf32, #tpu.memory_space<vmem>>, vector<128x128xf32>
    %1 = arith.truncf %0 : vector<128x128xf32> to vector<128x128xbf16>
    %c0_1 = arith.constant 0 : index
    %c0_2 = arith.constant 0 : index
    %2 = vector.load %arg2[%c0_1, %c0_2] : memref<128x128xbf16, #tpu.memory_space<vmem>>, vector<128x128xbf16>
    %cst = arith.constant dense<0.000000e+00> : vector<128x128xf32>
    %3 = tpu.matmul %1, %2, %cst {dimension_numbers = #tpu.dot_dimension_numbers<[1], [0], [0], [1], [0, 0, 1, 1], [], []>} : vector<128x128xbf16>, vector<128x128xbf16>, vector<128x128xf32> -> vector<128x128xf32>
    %4 = arith.truncf %3 : vector<128x128xf32> to vector<128x128xbf16>
    %c0_3 = arith.constant 0 : index
    %c0_4 = arith.constant 0 : index
    %5 = vector.load %arg3[%c0_3, %c0_4] : memref<128x128xbf16, #tpu.memory_space<vmem>>, vector<128x128xbf16>
    tpu.vector_store %arg3[%c0_3, %c0_4], %4 {strides = array<i32>} : memref<128x128xbf16, #tpu.memory_space<vmem>>, vector<128x128xbf16>,
    return
  }
  func.func @transform_0(%arg0: i32) -> (i32, i32) {
    %c0_i32 = arith.constant 0 : i32
    %c0_i32_0 = arith.constant 0 : i32
    return %arg0, %c0_i32 : i32, i32
  }
  func.func @transform_1(%arg0: i32) -> (i32, i32) {
    %c0_i32 = arith.constant 0 : i32
    %c0_i32_0 = arith.constant 0 : i32
    %c0_i32_1 = arith.constant 0 : i32
    return %c0_i32, %c0_i32_0 : i32, i32
  }
  func.func @transform_2(%arg0: i32) -> (i32, i32) {
    %c0_i32 = arith.constant 0 : i32
    %c0_i32_0 = arith.constant 0 : i32
    return %arg0, %c0_i32 : i32, i32
  }
}

</mosaic_0001>

<bundles_post_ra>
// kernel: tpu_custom_call.1
= control target key start
LH: loop header
LB: loop body
LE: loop exit
PB: predicated region body
PF: predicated region fallthrough
CT: control target
= control target key end

     0   :  { %7 = vsyncpa [#allocation3], 0  ;;  %s466_s0 = inlined_call_operand.hbm [shape: f32[128,128], index: 0, kind: input, shape index: {}]   ;;  %s467_s1 = inlined_call_operand.hbm [shape: bf16[128,128], index: 1, kind: input, shape index: {}]   ;;  %s468_s2 = inlined_call_operand.hbm [shape: bf16[128,128], index: 2, kind: output, shape index: {}]  }
   0x1   :  { %8 = vsyncpa [#allocation6], 0 }
   0x2   :  { %9 = vsyncpa [#allocation4], 0  ;;  %s14_s11 = sshll.u32 %s466_s0, 4  ;;  %s429_s12 = smov [#allocation2]   ;;  %s15_s11 = int_to_ptr.hbm [resolvable:$true] %s14_s11 }
   0x3   :  { %s16_s13 = sshll.u32 %s429_s12, 4  ;;  %s27_s16 = sshll.u32 %s467_s1, 4  ;;  %s17_s13 = int_to_ptr.vmem [resolvable:$true] %s16_s13  ;;  %s28_s16 = int_to_ptr.hbm [resolvable:$true] %s27_s16 }
   0x4   :  { %s430_s17 = smov 128   ;;  %s431_s18 = smov 8  }
   0x5   :  { %22 = dma.hbm_to_vmem [thread:$0]  %s15_s11, 2048, %s17_s13, [#allocation3], %s430_s17, %s430_s17, %s431_s18  }
   0x6   :  { %s432_s19 = smov [#allocation5]   ;;  %s433_s21 = smov 64  }
   0x7   :  { %s29_s20 = sshll.u32 %s432_s19, 4  ;;  %s434_s22 = smov 4   ;;  %s30_s20 = int_to_ptr.vmem [resolvable:$true] %s29_s20 }
   0x8   :  { %35 = dma.hbm_to_vmem [thread:$0]  %s28_s16, 1024, %s30_s20, [#allocation6], %s433_s21, %s433_s21, %s434_s22  }
   0x9   :  { %423 = dma.done.wait [#allocation3], 2048  }
   0xa   :  { %424 = vsyncadd [#allocation3], 4294965248 }
   0xb   :  { %425 = dma.done.wait [#allocation6], 1024  }
   0xc   :  { %426 = vsyncadd [#allocation6], 4294966272  ;;  %v272_v0 = vld [vmem:[#allocation5 + $0x38] sm:$0xff]  ;;  %v271_v1 = vld [vmem:[#allocation5 + $0x30] sm:$0xff]  ;;  %s435_s0 = smov [#allocation7]   ;;  %s219_s25 = sshll.u32 %s468_s2, 4  ;;  %s220_s25 = int_to_ptr.hbm [resolvable:$true] %s219_s25 }
   0xd   :  { %132 = vmatpush.bf16.msra.mxu0 %v272_v0  ;;  %320 = vmatpush.bf16.msra.mxu1 %v272_v0  ;;  %v270_v2 = vld [vmem:[#allocation5 + $0x28] sm:$0xff]  ;;  %v269_v3 = vld [vmem:[#allocation5 + $0x20] sm:$0xff]  ;;  %v268_v4 = vld [vmem:[#allocation5 + $0x18] sm:$0xff]  ;;  %s217_s1 = sshll.u32 %s435_s0, 4  ;;  %s218_s1 = int_to_ptr.vmem [resolvable:$true] %s217_s1 }
   0xe   :  { %321 = vmatpush.bf16.msra.mxu2 %v272_v0  ;;  %322 = vmatpush.bf16.msra.mxu3 %v272_v0  ;;  %v267_v5 = vld [vmem:[#allocation5 + $0x10] sm:$0xff]  ;;  %v266_v6 = vld [vmem:[#allocation5 + $0x8] sm:$0xff]  ;;  %v265_v7 = vld [vmem:[#allocation5] sm:$0xff] }
   0xf   :  { %v44_v8 = vld [vmem:[#allocation2] sm:$0xff]  ;;  %v45_v9 = vld [vmem:[#allocation2 + $0x8] sm:$0xff]  ;;  %v46_v20 = vld [vmem:[#allocation2 + $0x10] sm:$0xff] }
  0x10   :  { %v48_v10 = vld [vmem:[#allocation2 + $0x20] sm:$0xff]  ;;  %v49_v11 = vld [vmem:[#allocation2 + $0x28] sm:$0xff]  ;;  %v60_v16 = vpack.c.bf16 %v45_v9, %v44_v8  ;;  %v47_v21 = vld [vmem:[#allocation2 + $0x18] sm:$0xff] }
  0x11   :  { %133 = vmatpush.bf16.msra.mxu0 %v271_v1  ;;  %323 = vmatpush.bf16.msra.mxu1 %v271_v1  ;;  %v52_v12 = vld [vmem:[#allocation2 + $0x40] sm:$0xff]  ;;  %v53_v13 = vld [vmem:[#allocation2 + $0x48] sm:$0xff]  ;;  %v62_v17 = vpack.c.bf16 %v49_v11, %v48_v10  ;;  %v50_v22 = vld [vmem:[#allocation2 + $0x30] sm:$0xff]  ;;  %v61_v28 = vpack.c.bf16 %v47_v21, %v46_v20 }
  0x12   :  { %324 = vmatpush.bf16.msra.mxu2 %v271_v1  ;;  %325 = vmatpush.bf16.msra.mxu3 %v271_v1  ;;  %v56_v14 = vld [vmem:[#allocation2 + $0x60] sm:$0xff]  ;;  %v57_v15 = vld [vmem:[#allocation2 + $0x68] sm:$0xff]  ;;  %v64_v18 = vpack.c.bf16 %v53_v13, %v52_v12  ;;  %v51_v23 = vld [vmem:[#allocation2 + $0x38] sm:$0xff] }
  0x13   :  { %v66_v19 = vpack.c.bf16 %v57_v15, %v56_v14  ;;  %v54_v24 = vld [vmem:[#allocation2 + $0x50] sm:$0xff]  ;;  %v55_v25 = vld [vmem:[#allocation2 + $0x58] sm:$0xff]  ;;  %v63_v29 = vpack.c.bf16 %v51_v23, %v50_v22 }
  0x14   :  { %v58_v26 = vld [vmem:[#allocation2 + $0x70] sm:$0xff]  ;;  %v59_v27 = vld [vmem:[#allocation2 + $0x78] sm:$0xff]  ;;  %v65_v30 = vpack.c.bf16 %v55_v25, %v54_v24 }
  0x15   :  { %134 = vmatpush.bf16.msra.mxu0 %v270_v2  ;;  %326 = vmatpush.bf16.msra.mxu1 %v270_v2  ;;  %v67_v31 = vpack.c.bf16 %v59_v27, %v58_v26 }
  0x16   :  { %327 = vmatpush.bf16.msra.mxu2 %v270_v2  ;;  %328 = vmatpush.bf16.msra.mxu3 %v270_v2 }
  0x19   :  { %135 = vmatpush.bf16.msra.mxu0 %v269_v3  ;;  %329 = vmatpush.bf16.msra.mxu1 %v269_v3 }
  0x1a   :  { %330 = vmatpush.bf16.msra.mxu2 %v269_v3  ;;  %331 = vmatpush.bf16.msra.mxu3 %v269_v3 }
  0x1d   :  { %136 = vmatpush.bf16.msra.mxu0 %v268_v4  ;;  %332 = vmatpush.bf16.msra.mxu1 %v268_v4 }
  0x1e   :  { %333 = vmatpush.bf16.msra.mxu2 %v268_v4  ;;  %334 = vmatpush.bf16.msra.mxu3 %v268_v4 }
  0x21   :  { %137 = vmatpush.bf16.msra.mxu0 %v267_v5  ;;  %335 = vmatpush.bf16.msra.mxu1 %v267_v5 }
  0x22   :  { %336 = vmatpush.bf16.msra.mxu2 %v267_v5  ;;  %337 = vmatpush.bf16.msra.mxu3 %v267_v5 }
  0x25   :  { %138 = vmatpush.bf16.msra.mxu0 %v266_v6  ;;  %338 = vmatpush.bf16.msra.mxu1 %v266_v6 }
  0x26   :  { %339 = vmatpush.bf16.msra.mxu2 %v266_v6  ;;  %340 = vmatpush.bf16.msra.mxu3 %v266_v6 }
  0x29   :  { %139 = vmatpush.bf16.msra.mxu0 %v265_v7  ;;  %341 = vmatpush.bf16.msra.mxu1 %v265_v7 }
  0x2a   :  { %342 = vmatpush.bf16.msra.mxu2 %v265_v7  ;;  %343 = vmatpush.bf16.msra.mxu3 %v265_v7 }
  0x2c   :  { %140 = vmatmul.bf16.vlgmr.msra.gmra.mxu0 %v60_v16  ;;  %150 = vmatmul.bf16.vlgmr.msra.gmra.mxu1 %v62_v17 }
  0x2d   :  { %160 = vmatmul.bf16.vlgmr.msra.gmra.mxu2 %v64_v18  ;;  %170 = vmatmul.bf16.vlgmr.msra.gmra.mxu3 %v66_v19 }
  0x3c   :  { %145 = vmatmul.bf16.gmra.mxu0 %v61_v28  ;;  %155 = vmatmul.bf16.gmra.mxu1 %v63_v29 }
  0x3d   :  { %165 = vmatmul.bf16.gmra.mxu2 %v65_v30  ;;  %175 = vmatmul.bf16.gmra.mxu3 %v67_v31 }
  0xa9   :  { %v141_v32 = vpop.f32.mrf.mxu0  ;;  %v151_v33 = vpop.f32.mrf.mxu1 }
  0xb0   :  { %v161_v34 = vpop.f32.mrf.mxu2  ;;  %v171_v35 = vpop.f32.mrf.mxu3 }
  0xb1   :  { %v143_v36 = vpop.f32.mrf.mxu0  ;;  %v153_v37 = vpop.f32.mrf.mxu1 }
  0xb2   :  { %v276_v38 = vpack.c.bf16 %v143_v36, %v141_v32  ;;  %v286_v39 = vpack.c.bf16 %v153_v37, %v151_v33 }
  0xb4   :  { %277 = vst [vmem:[#allocation7] sm:$0xff] %v276_v38  }
  0xb5   :  { %314 = vst [vmem:[#allocation7 + $0x10] sm:$0xff] %v286_v39  }
  0xb8   :  { %v163_v40 = vpop.f32.mrf.mxu2  ;;  %v173_v41 = vpop.f32.mrf.mxu3 }
  0xb9   :  { %v296_v42 = vpack.c.bf16 %v163_v40, %v161_v34  ;;  %v306_v43 = vpack.c.bf16 %v173_v41, %v171_v35  ;;  %v146_v44 = vpop.f32.mrf.mxu0  ;;  %v156_v45 = vpop.f32.mrf.mxu1 }
  0xbb   :  { %316 = vst [vmem:[#allocation7 + $0x20] sm:$0xff] %v296_v42  }
  0xbc   :  { %318 = vst [vmem:[#allocation7 + $0x30] sm:$0xff] %v306_v43  }
  0xc0   :  { %v166_v46 = vpop.f32.mrf.mxu2  ;;  %v176_v47 = vpop.f32.mrf.mxu3 }
  0xc1   :  { %v148_v48 = vpop.f32.mrf.mxu0  ;;  %v158_v49 = vpop.f32.mrf.mxu1 }
  0xc2   :  { %v281_v50 = vpack.c.bf16 %v148_v48, %v146_v44  ;;  %v291_v51 = vpack.c.bf16 %v158_v49, %v156_v45 }
  0xc4   :  { %313 = vst [vmem:[#allocation7 + $0x8] sm:$0xff] %v281_v50  }
  0xc5   :  { %315 = vst [vmem:[#allocation7 + $0x18] sm:$0xff] %v291_v51  }
  0xc8   :  { %v168_v52 = vpop.f32.mrf.mxu2  ;;  %v178_v53 = vpop.f32.mrf.mxu3 }
  0xc9   :  { %v301_v54 = vpack.c.bf16 %v168_v52, %v166_v46  ;;  %v311_v55 = vpack.c.bf16 %v178_v53, %v176_v47 }
  0xcb   :  { %317 = vst [vmem:[#allocation7 + $0x28] sm:$0xff] %v301_v54  }
  0xcc   :  { %319 = vst [vmem:[#allocation7 + $0x38] sm:$0xff] %v311_v55  }
  0xcd   :  { %225 = dma.vmem_to_hbm [thread:$0]  %s218_s1, 1024, %s220_s25, [#allocation4], %s433_s21, %s433_s21, %s434_s22  }
  0xce   :  { %427 = dma.done.wait [#allocation4], 1024  }
  0xcf   :  { %428 = vsyncadd [#allocation4], 4294966272 }
  0xd0   :  { %230 = vsyncpa [#allocation3], 1 }
  0xd1   :  { %231 = vsyncpa [#allocation6], 1 }
  0xd2   :  { %232 = vsyncpa [#allocation4], 1 }

</bundles_post_ra>
